<compile_context>
chip_gen: v6e
topology: v6e:2x2x1
jax: 0.10.0
libtpu: 0.0.40
codegen_flags: <defaults>
</compile_context>

<pallas_src>
import math

import jax
import jax.numpy as jnp
from jax import lax
from jax.experimental import pallas as pl
from jax.experimental.pallas import tpu as pltpu


_VMEM = pl.BlockSpec(memory_space=pltpu.MemorySpace.VMEM)


# ----------------------------------------------------------------------------
# Fused kernel: tap-accumulated conv -> bias -> ReLU -> BatchNorm -> wide store
# ----------------------------------------------------------------------------
def _make_fused_kernel(*, B, Cin, Cout, H, W, f, p, eps):
    Hp, Wp = H + 2 * p, W + 2 * p
    Ho, Wo = Hp - f + 1, Wp - f + 1
    Mw = B * Hp * Wp                      # "wide" column count (incl. pad cols)
    inv_count = 1.0 / float(B * Ho * Wo)  # BN averages over valid positions only

    def kernel(x_ref, w_ref, b_ref, g_ref, beta_ref, o_ref):
        # x_ref    : (Cin, Mw + s_max)  bf16  zero-padded, channel-major, flat
        # w_ref    : (f*f, Cout, Cin)   bf16  per-tap weight matrices (ky, kx)
        # b_ref    : (Cout, 1)          f32   conv bias
        # g_ref    : (Cout, 1)          f32   BN gamma
        # beta_ref : (Cout, 1)          f32   BN beta
        # o_ref    : (Cout, Mw)         f32   wide (uncropped) output slab

        xv = x_ref[...]                   # one bf16 load of the whole slab

        # ---- conv: f*f tap matmuls accumulated in f32 (no im2col scratch) ----
        # acc[o, b*Hp*Wp + i*Wp + j] = sum_{ky,kx,c} W[o,c,ky,kx] * xpad[b,c,i+ky,j+kx]
        acc = jnp.zeros((Cout, Mw), jnp.float32)
        for ky in range(f):               # small fixed trip count: keep unrolled
            for kx in range(f):
                t = ky * f + kx
                s = ky * Wp + kx          # flat lane shift for this tap
                acc = acc + jnp.dot(w_ref[t], xv[:, s:s + Mw],
                                    preferred_element_type=jnp.float32)

        # ---- bias + ReLU ------------------------------------------------------
        acc = jnp.maximum(acc + b_ref[...], 0.0)

        # ---- validity mask over wide columns (pad cols excluded from stats) ---
        midx = lax.broadcasted_iota(jnp.int32, (1, Mw), 1)
        within = lax.rem(midx, Hp * Wp)
        i_idx = lax.div(within, Wp)
        j_idx = lax.rem(within, Wp)
        mask = ((i_idx < Ho) & (j_idx < Wo)).astype(jnp.float32)   # (1, Mw)

        # ---- BatchNorm2d (train-mode batch stats, biased var), single pass ----
        am = acc * mask
        s1 = jnp.sum(am, axis=1, keepdims=True)                    # (Cout, 1)
        s2 = jnp.sum(am * am, axis=1, keepdims=True)
        mean = s1 * inv_count
        var = jnp.maximum(s2 * inv_count - mean * mean, 0.0)
        scale = g_ref[...] * lax.rsqrt(var + eps)
        shift = beta_ref[...] - mean * scale

        # ---- single wide lane-dense store (crop + NCHW transpose in wrapper) --
        o_ref[...] = acc * scale + shift

    return kernel


# ----------------------------------------------------------------------------
# Wrapper: tiny one-time layout prep + gridless pallas_call + cheap crop
# ----------------------------------------------------------------------------
def conv_relu_forward(params, x_nchw, *, padding, eps=1e-5):
    """ConvRelu.forward: Conv2d(pad) -> ReLU -> BatchNorm2d (train-mode stats)."""
    w_oihw, bias = params["conv_w"], params["conv_b"]
    gamma, beta = params["bn_gamma"], params["bn_beta"]

    B, Cin, H, W = x_nchw.shape
    Cout, Cin_w, f, f2 = w_oihw.shape
    assert Cin_w == Cin and f == f2
    p = padding
    Hp, Wp = H + 2 * p, W + 2 * p
    Ho, Wo = Hp - f + 1, Wp - f + 1
    Mw = B * Hp * Wp
    s_max = (f - 1) * Wp + (f - 1)

    # One-time, tiny XLA-side layout prep (few KB): zero-pad, channel-major,
    # spatially flattened, bf16, plus s_max trailing zero lanes for tap shifts.
    xp = jnp.pad(x_nchw, ((0, 0), (0, 0), (p, p), (p, p)))          # (B,Cin,Hp,Wp)
    x_wide = jnp.transpose(xp, (1, 0, 2, 3)).reshape(Cin, Mw)       # (Cin, Mw)
    x_wide = jnp.pad(x_wide, ((0, 0), (0, s_max))).astype(jnp.bfloat16)

    # Per-tap weight matrices, bf16 MXU operands; bias / BN params stay f32.
    w_taps = jnp.transpose(w_oihw, (2, 3, 0, 1)).reshape(f * f, Cout, Cin)
    w_taps = w_taps.astype(jnp.bfloat16)
    b2 = bias.reshape(Cout, 1).astype(jnp.float32)
    g2 = gamma.reshape(Cout, 1).astype(jnp.float32)
    be2 = beta.reshape(Cout, 1).astype(jnp.float32)

    kernel = _make_fused_kernel(B=B, Cin=Cin, Cout=Cout, H=H, W=W, f=f, p=p,
                                eps=eps)

    flops = 2 * Cout * (f * f * Cin) * Mw + 10 * Cout * Mw
    bytes_accessed = (2 * (x_wide.size + w_taps.size)
                      + 4 * (3 * Cout + Cout * Mw))

    out_wide = pl.pallas_call(
        kernel,
        out_shape=jax.ShapeDtypeStruct((Cout, Mw), jnp.float32),
        in_specs=[_VMEM] * 5,
        out_specs=_VMEM,
        cost_estimate=pl.CostEstimate(flops=flops, transcendentals=Cout,
                                      bytes_accessed=bytes_accessed),
    )(x_wide, w_taps, b2, g2, be2)

    # Cheap XLA-side crop of valid columns and back to NCHW (tens of KB).
    out = out_wide.reshape(Cout, B, Hp, Wp)[:, :, :Ho, :Wo]
    return jnp.transpose(out, (1, 0, 2, 3))


# ----------------------------------------------------------------------------
# Parameter init mirroring the module (weights_init + PyTorch defaults)
# ----------------------------------------------------------------------------
def init_params(key, in_channels, out_channels, kernel_size):
    k_w, k_b = jax.random.split(key)
    n = kernel_size * kernel_size * out_channels          # module's weights_init
    w = math.sqrt(2.0 / n) * jax.random.normal(
        k_w, (out_channels, in_channels, kernel_size, kernel_size), jnp.float32)
    bound = 1.0 / math.sqrt(in_channels * kernel_size * kernel_size)
    b = jax.random.uniform(k_b, (out_channels,), jnp.float32, -bound, bound)
    return {
        "conv_w": w,
        "conv_b": b,
        "bn_gamma": jnp.ones((out_channels,), jnp.float32),
        "bn_beta": jnp.zeros((out_channels,), jnp.float32),
    }


# ----------------------------------------------------------------------------
# Pure-JAX reference with the SAME pinned operand precision (bf16 operands,
# f32 accumulation) so the tolerance can be tight.
# ----------------------------------------------------------------------------
def conv_relu_reference(params, x, *, padding, eps=1e-5):
    wq = params["conv_w"].astype(jnp.bfloat16).astype(jnp.float32)
    xq = x.astype(jnp.bfloat16).astype(jnp.float32)
    y = lax.conv_general_dilated(
        xq, wq, window_strides=(1, 1),
        padding=[(padding, padding), (padding, padding)],
        dimension_numbers=("NCHW", "OIHW", "NCHW"),
        precision=lax.Precision.HIGHEST)
    y = y + params["conv_b"].reshape(1, -1, 1, 1)
    y = jnp.maximum(y, 0.0)
    mean = jnp.mean(y, axis=(0, 2, 3), keepdims=True)
    var = jnp.mean((y - mean) ** 2, axis=(0, 2, 3), keepdims=True)
    y = (y - mean) * lax.rsqrt(var + eps)
    return (y * params["bn_gamma"].reshape(1, -1, 1, 1)
            + params["bn_beta"].reshape(1, -1, 1, 1))


if __name__ == "__main__":
    key = jax.random.PRNGKey(0)
    k_x, k_p = jax.random.split(key)

    # ConvRelu(in_channels=4, out_channels=8, kernel_size=3, padding=1)
    in_channels, out_channels, kernel_size, padding = 4, 8, 3, 1
    B, H, W = 2, 16, 16
    Ho = H + 2 * padding - kernel_size + 1
    Wo = W + 2 * padding - kernel_size + 1

    x = jax.random.normal(k_x, (B, in_channels, H, W), jnp.float32)
    params = init_params(k_p, in_channels, out_channels, kernel_size)

    out = conv_relu_forward(params, x, padding=padding)
    out = jax.block_until_ready(out)

    assert out.shape == (B, out_channels, Ho, Wo), out.shape
    assert bool(jnp.all(jnp.isfinite(out)))

    # Tight tolerance: kernel and reference use identical bf16-quantized
    # operands with f32 accumulation, so only reduction-order noise remains.
    ref = conv_relu_reference(params, x, padding=padding)
    max_err = float(jnp.max(jnp.abs(out - ref)))
    assert max_err < 2e-3, f"max abs err {max_err}"

    print("KERNEL_OK")
</pallas_src>

<mosaic_0001>
module attributes {stable_mosaic.version = 11 : i64} {
  func.func @kernel(%arg0: memref<4x686xbf16, #tpu.memory_space<vmem>>, %arg1: memref<9x8x4xbf16, #tpu.memory_space<vmem>>, %arg2: memref<8x1xf32, #tpu.memory_space<vmem>>, %arg3: memref<8x1xf32, #tpu.memory_space<vmem>>, %arg4: memref<8x1xf32, #tpu.memory_space<vmem>>, %arg5: memref<8x648xf32, #tpu.memory_space<vmem>>) attributes {dimension_semantics = [], scalar_prefetch = 0 : i64, scratch_operands = 0 : i64, tpu.core_type = #tpu.core_type<tc>} {
    %c0 = arith.constant 0 : index
    %c0_0 = arith.constant 0 : index
    %0 = vector.load %arg0[%c0, %c0_0] : memref<4x686xbf16, #tpu.memory_space<vmem>>, vector<4x686xbf16>
    %cst = arith.constant 0.000000e+00 : f32
    %1 = vector.broadcast %cst : f32 to vector<8x648xf32>
    %c0_1 = arith.constant 0 : index
    %c0_2 = arith.constant 0 : index
    %c0_3 = arith.constant 0 : index
    %2 = vector.load %arg1[%c0_1, %c0_2, %c0_3] : memref<9x8x4xbf16, #tpu.memory_space<vmem>>, vector<1x8x4xbf16>
    %3 = vector.shape_cast %2 : vector<1x8x4xbf16> to vector<8x4xbf16>
    %4 = vector.extract_strided_slice %0 {offsets = [0, 0], sizes = [4, 648], strides = [1, 1]} : vector<4x686xbf16> to vector<4x648xbf16>
    %cst_4 = arith.constant dense<0.000000e+00> : vector<8x648xf32>
    %5 = tpu.matmul %3, %4, %cst_4 {dimension_numbers = #tpu.dot_dimension_numbers<[1], [0], [0], [1], [0, 0, 1, 1], [], []>} : vector<8x4xbf16>, vector<4x648xbf16>, vector<8x648xf32> -> vector<8x648xf32>
    %6 = arith.addf %1, %5 : vector<8x648xf32>
    %c1 = arith.constant 1 : index
    %c0_5 = arith.constant 0 : index
    %c0_6 = arith.constant 0 : index
    %7 = vector.load %arg1[%c1, %c0_5, %c0_6] : memref<9x8x4xbf16, #tpu.memory_space<vmem>>, vector<1x8x4xbf16>
    %8 = vector.shape_cast %7 : vector<1x8x4xbf16> to vector<8x4xbf16>
    %9 = vector.extract_strided_slice %0 {offsets = [0, 1], sizes = [4, 648], strides = [1, 1]} : vector<4x686xbf16> to vector<4x648xbf16>
    %cst_7 = arith.constant dense<0.000000e+00> : vector<8x648xf32>
    %10 = tpu.matmul %8, %9, %cst_7 {dimension_numbers = #tpu.dot_dimension_numbers<[1], [0], [0], [1], [0, 0, 1, 1], [], []>} : vector<8x4xbf16>, vector<4x648xbf16>, vector<8x648xf32> -> vector<8x648xf32>
    %11 = arith.addf %6, %10 : vector<8x648xf32>
    %c2 = arith.constant 2 : index
    %c0_8 = arith.constant 0 : index
    %c0_9 = arith.constant 0 : index
    %12 = vector.load %arg1[%c2, %c0_8, %c0_9] : memref<9x8x4xbf16, #tpu.memory_space<vmem>>, vector<1x8x4xbf16>
    %13 = vector.shape_cast %12 : vector<1x8x4xbf16> to vector<8x4xbf16>
    %14 = vector.extract_strided_slice %0 {offsets = [0, 2], sizes = [4, 648], strides = [1, 1]} : vector<4x686xbf16> to vector<4x648xbf16>
    %cst_10 = arith.constant dense<0.000000e+00> : vector<8x648xf32>
    %15 = tpu.matmul %13, %14, %cst_10 {dimension_numbers = #tpu.dot_dimension_numbers<[1], [0], [0], [1], [0, 0, 1, 1], [], []>} : vector<8x4xbf16>, vector<4x648xbf16>, vector<8x648xf32> -> vector<8x648xf32>
    %16 = arith.addf %11, %15 : vector<8x648xf32>
    %c3 = arith.constant 3 : index
    %c0_11 = arith.constant 0 : index
    %c0_12 = arith.constant 0 : index
    %17 = vector.load %arg1[%c3, %c0_11, %c0_12] : memref<9x8x4xbf16, #tpu.memory_space<vmem>>, vector<1x8x4xbf16>
    %18 = vector.shape_cast %17 : vector<1x8x4xbf16> to vector<8x4xbf16>
    %19 = vector.extract_strided_slice %0 {offsets = [0, 18], sizes = [4, 648], strides = [1, 1]} : vector<4x686xbf16> to vector<4x648xbf16>
    %cst_13 = arith.constant dense<0.000000e+00> : vector<8x648xf32>
    %20 = tpu.matmul %18, %19, %cst_13 {dimension_numbers = #tpu.dot_dimension_numbers<[1], [0], [0], [1], [0, 0, 1, 1], [], []>} : vector<8x4xbf16>, vector<4x648xbf16>, vector<8x648xf32> -> vector<8x648xf32>
    %21 = arith.addf %16, %20 : vector<8x648xf32>
    %c4 = arith.constant 4 : index
    %c0_14 = arith.constant 0 : index
    %c0_15 = arith.constant 0 : index
    %22 = vector.load %arg1[%c4, %c0_14, %c0_15] : memref<9x8x4xbf16, #tpu.memory_space<vmem>>, vector<1x8x4xbf16>
    %23 = vector.shape_cast %22 : vector<1x8x4xbf16> to vector<8x4xbf16>
    %24 = vector.extract_strided_slice %0 {offsets = [0, 19], sizes = [4, 648], strides = [1, 1]} : vector<4x686xbf16> to vector<4x648xbf16>
    %cst_16 = arith.constant dense<0.000000e+00> : vector<8x648xf32>
    %25 = tpu.matmul %23, %24, %cst_16 {dimension_numbers = #tpu.dot_dimension_numbers<[1], [0], [0], [1], [0, 0, 1, 1], [], []>} : vector<8x4xbf16>, vector<4x648xbf16>, vector<8x648xf32> -> vector<8x648xf32>
    %26 = arith.addf %21, %25 : vector<8x648xf32>
    %c5 = arith.constant 5 : index
    %c0_17 = arith.constant 0 : index
    %c0_18 = arith.constant 0 : index
    %27 = vector.load %arg1[%c5, %c0_17, %c0_18] : memref<9x8x4xbf16, #tpu.memory_space<vmem>>, vector<1x8x4xbf16>
    %28 = vector.shape_cast %27 : vector<1x8x4xbf16> to vector<8x4xbf16>
    %29 = vector.extract_strided_slice %0 {offsets = [0, 20], sizes = [4, 648], strides = [1, 1]} : vector<4x686xbf16> to vector<4x648xbf16>
    %cst_19 = arith.constant dense<0.000000e+00> : vector<8x648xf32>
    %30 = tpu.matmul %28, %29, %cst_19 {dimension_numbers = #tpu.dot_dimension_numbers<[1], [0], [0], [1], [0, 0, 1, 1], [], []>} : vector<8x4xbf16>, vector<4x648xbf16>, vector<8x648xf32> -> vector<8x648xf32>
    %31 = arith.addf %26, %30 : vector<8x648xf32>
    %c6 = arith.constant 6 : index
    %c0_20 = arith.constant 0 : index
    %c0_21 = arith.constant 0 : index
    %32 = vector.load %arg1[%c6, %c0_20, %c0_21] : memref<9x8x4xbf16, #tpu.memory_space<vmem>>, vector<1x8x4xbf16>
    %33 = vector.shape_cast %32 : vector<1x8x4xbf16> to vector<8x4xbf16>
    %34 = vector.extract_strided_slice %0 {offsets = [0, 36], sizes = [4, 648], strides = [1, 1]} : vector<4x686xbf16> to vector<4x648xbf16>
    %cst_22 = arith.constant dense<0.000000e+00> : vector<8x648xf32>
    %35 = tpu.matmul %33, %34, %cst_22 {dimension_numbers = #tpu.dot_dimension_numbers<[1], [0], [0], [1], [0, 0, 1, 1], [], []>} : vector<8x4xbf16>, vector<4x648xbf16>, vector<8x648xf32> -> vector<8x648xf32>
    %36 = arith.addf %31, %35 : vector<8x648xf32>
    %c7 = arith.constant 7 : index
    %c0_23 = arith.constant 0 : index
    %c0_24 = arith.constant 0 : index
    %37 = vector.load %arg1[%c7, %c0_23, %c0_24] : memref<9x8x4xbf16, #tpu.memory_space<vmem>>, vector<1x8x4xbf16>
    %38 = vector.shape_cast %37 : vector<1x8x4xbf16> to vector<8x4xbf16>
    %39 = vector.extract_strided_slice %0 {offsets = [0, 37], sizes = [4, 648], strides = [1, 1]} : vector<4x686xbf16> to vector<4x648xbf16>
    %cst_25 = arith.constant dense<0.000000e+00> : vector<8x648xf32>
    %40 = tpu.matmul %38, %39, %cst_25 {dimension_numbers = #tpu.dot_dimension_numbers<[1], [0], [0], [1], [0, 0, 1, 1], [], []>} : vector<8x4xbf16>, vector<4x648xbf16>, vector<8x648xf32> -> vector<8x648xf32>
    %41 = arith.addf %36, %40 : vector<8x648xf32>
    %c8 = arith.constant 8 : index
    %c0_26 = arith.constant 0 : index
    %c0_27 = arith.constant 0 : index
    %42 = vector.load %arg1[%c8, %c0_26, %c0_27] : memref<9x8x4xbf16, #tpu.memory_space<vmem>>, vector<1x8x4xbf16>
    %43 = vector.shape_cast %42 : vector<1x8x4xbf16> to vector<8x4xbf16>
    %44 = vector.extract_strided_slice %0 {offsets = [0, 38], sizes = [4, 648], strides = [1, 1]} : vector<4x686xbf16> to vector<4x648xbf16>
    %cst_28 = arith.constant dense<0.000000e+00> : vector<8x648xf32>
    %45 = tpu.matmul %43, %44, %cst_28 {dimension_numbers = #tpu.dot_dimension_numbers<[1], [0], [0], [1], [0, 0, 1, 1], [], []>} : vector<8x4xbf16>, vector<4x648xbf16>, vector<8x648xf32> -> vector<8x648xf32>
    %46 = arith.addf %41, %45 : vector<8x648xf32>
    %c0_29 = arith.constant 0 : index
    %c0_30 = arith.constant 0 : index
    %47 = vector.load %arg2[%c0_29, %c0_30] : memref<8x1xf32, #tpu.memory_space<vmem>>, vector<8x1xf32>
    %48 = vector.broadcast %47 : vector<8x1xf32> to vector<8x648xf32>
    %49 = arith.addf %46, %48 : vector<8x648xf32>
    %cst_31 = arith.constant 0.000000e+00 : f32
    %50 = vector.broadcast %cst_31 : f32 to vector<8x648xf32>
    %51 = arith.maximumf %49, %50 : vector<8x648xf32>
    %52 = tpu.iota {dimensions = array<i32: 1>} : vector<1x648xi32>
    %c324_i32 = arith.constant 324 : i32
    %53 = vector.broadcast %c324_i32 : i32 to vector<1x648xi32>
    %54 = arith.remsi %52, %53 : vector<1x648xi32>
    %c18_i32 = arith.constant 18 : i32
    %55 = vector.broadcast %c18_i32 : i32 to vector<1x648xi32>
    %56 = arith.divsi %54, %55 : vector<1x648xi32>
    %c18_i32_32 = arith.constant 18 : i32
    %57 = vector.broadcast %c18_i32_32 : i32 to vector<1x648xi32>
    %58 = arith.remsi %54, %57 : vector<1x648xi32>
    %c16_i32 = arith.constant 16 : i32
    %59 = vector.broadcast %c16_i32 : i32 to vector<1x648xi32>
    %60 = arith.cmpi slt, %56, %59 : vector<1x648xi32>
    %c16_i32_33 = arith.constant 16 : i32
    %61 = vector.broadcast %c16_i32_33 : i32 to vector<1x648xi32>
    %62 = arith.cmpi slt, %58, %61 : vector<1x648xi32>
    %63 = arith.andi %60, %62 : vector<1x648xi1>
    %64 = arith.extui %63 : vector<1x648xi1> to vector<1x648xi32>
    %65 = arith.sitofp %64 : vector<1x648xi32> to vector<1x648xf32>
    %66 = vector.broadcast %65 : vector<1x648xf32> to vector<8x648xf32>
    %67 = arith.mulf %51, %66 : vector<8x648xf32>
    %cst_34 = arith.constant dense<0.000000e+00> : vector<8xf32>
    %68 = vector.multi_reduction <add>, %67, %cst_34 [1] : vector<8x648xf32> to vector<8xf32>
    %69 = vector.shape_cast %68 : vector<8xf32> to vector<8x1xf32>
    %70 = arith.mulf %67, %67 : vector<8x648xf32>
    %cst_35 = arith.constant dense<0.000000e+00> : vector<8xf32>
    %71 = vector.multi_reduction <add>, %70, %cst_35 [1] : vector<8x648xf32> to vector<8xf32>
    %72 = vector.shape_cast %71 : vector<8xf32> to vector<8x1xf32>
    %cst_36 = arith.constant 0.001953125 : f32
    %73 = vector.broadcast %cst_36 : f32 to vector<8x1xf32>
    %74 = arith.mulf %69, %73 : vector<8x1xf32>
    %cst_37 = arith.constant 0.001953125 : f32
    %75 = vector.broadcast %cst_37 : f32 to vector<8x1xf32>
    %76 = arith.mulf %72, %75 : vector<8x1xf32>
    %77 = arith.mulf %74, %74 : vector<8x1xf32>
    %78 = arith.subf %76, %77 : vector<8x1xf32>
    %cst_38 = arith.constant 0.000000e+00 : f32
    %79 = vector.broadcast %cst_38 : f32 to vector<8x1xf32>
    %80 = arith.maximumf %78, %79 : vector<8x1xf32>
    %c0_39 = arith.constant 0 : index
    %c0_40 = arith.constant 0 : index
    %81 = vector.load %arg3[%c0_39, %c0_40] : memref<8x1xf32, #tpu.memory_space<vmem>>, vector<8x1xf32>
    %cst_41 = arith.constant 9.99999974E-6 : f32
    %82 = vector.broadcast %cst_41 : f32 to vector<8x1xf32>
    %83 = arith.addf %80, %82 : vector<8x1xf32>
    %84 = math.rsqrt %83 : vector<8x1xf32>
    %85 = arith.mulf %81, %84 : vector<8x1xf32>
    %c0_42 = arith.constant 0 : index
    %c0_43 = arith.constant 0 : index
    %86 = vector.load %arg4[%c0_42, %c0_43] : memref<8x1xf32, #tpu.memory_space<vmem>>, vector<8x1xf32>
    %87 = arith.mulf %74, %85 : vector<8x1xf32>
    %88 = arith.subf %86, %87 : vector<8x1xf32>
    %89 = vector.broadcast %85 : vector<8x1xf32> to vector<8x648xf32>
    %90 = arith.mulf %51, %89 : vector<8x648xf32>
    %91 = vector.broadcast %88 : vector<8x1xf32> to vector<8x648xf32>
    %92 = arith.addf %90, %91 : vector<8x648xf32>
    %c0_44 = arith.constant 0 : index
    %c0_45 = arith.constant 0 : index
    %93 = vector.load %arg5[%c0_44, %c0_45] : memref<8x648xf32, #tpu.memory_space<vmem>>, vector<8x648xf32>
    tpu.vector_store %arg5[%c0_44, %c0_45], %92 {strides = array<i32>} : memref<8x648xf32, #tpu.memory_space<vmem>>, vector<8x648xf32>,
    return
  }
}

</mosaic_0001>

<bundles_post_ra>
// kernel: tpu_custom_call.1
= control target key start
LH: loop header
LB: loop body
LE: loop exit
PB: predicated region body
PF: predicated region fallthrough
CT: control target
= control target key end

     0   :  { %v33_v1 = vlaneseq  ;;  %v2032_v2 = vmov 1983009808   ;;  %s2633_s0 = inlined_call_operand.vmem [shape: bf16[4,686], index: 0, kind: input, shape index: {}]   ;;  %s2634_s1 = inlined_call_operand.vmem [shape: bf16[9,8,4], index: 1, kind: input, shape index: {}]   ;;  %s2635_s2 = inlined_call_operand.vmem [shape: f32[8,1], index: 2, kind: input, shape index: {}]   ;;  %s2636_s3 = inlined_call_operand.vmem [shape: f32[8,1], index: 3, kind: input, shape index: {}]   ;;  %s2637_s4 = inlined_call_operand.vmem [shape: f32[8,1], index: 4, kind: input, shape index: {}]   ;;  %s2638_s5 = inlined_call_operand.hbm [shape: f32[8,648], index: 5, kind: output, shape index: {}]  }
   0x1   :  { %v22_v0 = vld [vmem:[%s2633_s0] sm:$0xff]  ;;  %v31_v3 = vunpack.c.l.s4 %v2032_v2 }
   0x2   :  { %v34_v4 = vshrl.u32 %v33_v1, 7 }
   0x3   :  { %10 = vsyncpa [#allocation3], 0  ;;  %v32_v5 = vunpack.c.0.s8 %v31_v3  ;;  %v29_v6 = vcombine.high %v22_v0, %v22_v0  ;;  %v2033_v7 = vmov 0   ;;  %s2034_s20 = smov 127   ;;  %s2035_s23 = smov 126   ;;  %v1552_v15 = vld [vmem:[%s2635_s2] sm:$0xff] }
   0x4   :  { %127 = vmatprep.mubr.bf16.mxu0 %v2033_v7  ;;  %168 = vmatprep.mubr.bf16.mxu1 %v2033_v7  ;;  %v2099_v13 = vld.sshfl [vmem:[%s2633_s0 + $0x8] sm:$0x33 pattern:$0x76325410]  ;;  %s2036_s0 = smov 110   ;;  %s2037_s24 = smov 109  }
   0x5   :  { %v35_v8 = vsub.s32 %v32_v5, %v34_v4  ;;  %2005 = vset.pattern.permute.xlu0 %v2033_v7  ;;  %2006 = vset.pattern.permute.xlu1 %v2033_v7  ;;  %v2105_v14 = vcombine.high %v2099_v13, %v2099_v13  ;;  %s2038_s25 = smov 108   ;;  %s2039_s26 = smov 92   ;;  %vm66_vm0 = vcmask 1039360   ;;  %vm76_vm1 = vcmask 1041408   ;;  %v1888_v23 = vld [vmem:[%s2634_s1 + $0x4] sm:$0xf] }
   0x6   :  { %s2040_s27 = smov 91   ;;  %s2041_s28 = smov 90   ;;  %vm72_vm2 = vcmask 31744   ;;  %vm376_vm3 = vcmask 1031168   ;;  %v24_v38 = vld [vmem:[%s2634_s1] sm:$0xf] }
   0x7   :  { %v2082_v9 = vrot.slane %v22_v0, %v35_v8  ;;  %v2084_v10 = vrot.slane %v29_v6, %v35_v8  ;;  %v234_v39 = vsel %vm76_vm1, %v2099_v13, 0  ;;  %vm546_vm4 = vcmask 900096   ;;  %v1902_v53 = vld [vmem:[%s2634_s1 + $0x8] sm:$0xf]  ;;  %v1909_v5 = vld [vmem:[%s2634_s1 + $0xc] sm:$0xf] }
   0x8   :  { %vm716_vm5 = vcmask 891904   ;;  %vm886_vm6 = vcmask 883712   ;;  %vm1056_vm7 = vcmask 752640   ;;  %vm1226_vm8 = vcmask 744448  }
   0x9   :  { %54 = vrot.lane.b32.xlu0 %v2082_v9, %s2034_s20  ;;  %58 = vrot.lane.b32.xlu1 %v2084_v10, %s2034_s20  ;;  %v2090_v11 = vcombine.high %v2082_v9, %v2082_v9  ;;  %v2094_v12 = vcombine.high %v2084_v10, %v2084_v10  ;;  %v222_v31 = vsel %vm76_vm1, %v2082_v9, 0  ;;  %v228_v34 = vsel %vm76_vm1, %v2084_v10, 0 }
   0xa   :  { %vm1396_vm9 = vcmask 736256  }
   0xd   :  { %56 = vrot.lane.b32.xlu0 %v2090_v11, %s2034_s20  ;;  %60 = vrot.lane.b32.xlu1 %v2094_v12, %s2034_s20 }
  0x11   :  { %62 = vrot.lane.b32.xlu0 %v2099_v13, %s2034_s20  ;;  %64 = vrot.lane.b32.xlu1 %v2105_v14, %s2034_s20 }
  0x15   :  { %364 = vrot.lane.b32.xlu0 %v2082_v9, %s2035_s23  ;;  %366 = vrot.lane.b32.xlu1 %v2090_v11, %s2035_s23 }
  0x19   :  { %368 = vrot.lane.b32.xlu0 %v2084_v10, %s2035_s23  ;;  %370 = vrot.lane.b32.xlu1 %v2094_v12, %s2035_s23 }
  0x1d   :  { %372 = vrot.lane.b32.xlu0 %v2099_v13, %s2035_s23  ;;  %374 = vrot.lane.b32.xlu1 %v2105_v14, %s2035_s23 }
  0x21   :  { %534 = vrot.lane.b32.xlu0 %v2082_v9, %s2036_s0  ;;  %536 = vrot.lane.b32.xlu1 %v2090_v11, %s2036_s0 }
  0x25   :  { %538 = vrot.lane.b32.xlu0 %v2084_v10, %s2036_s0  ;;  %540 = vrot.lane.b32.xlu1 %v2094_v12, %s2036_s0 }
  0x29   :  { %542 = vrot.lane.b32.xlu0 %v2099_v13, %s2036_s0  ;;  %544 = vrot.lane.b32.xlu1 %v2105_v14, %s2036_s0 }
  0x2d   :  { %704 = vrot.lane.b32.xlu0 %v2082_v9, %s2037_s24  ;;  %706 = vrot.lane.b32.xlu1 %v2090_v11, %s2037_s24 }
  0x31   :  { %708 = vrot.lane.b32.xlu0 %v2084_v10, %s2037_s24  ;;  %710 = vrot.lane.b32.xlu1 %v2094_v12, %s2037_s24 }
  0x35   :  { %712 = vrot.lane.b32.xlu0 %v2099_v13, %s2037_s24  ;;  %714 = vrot.lane.b32.xlu1 %v2105_v14, %s2037_s24 }
  0x39   :  { %874 = vrot.lane.b32.xlu0 %v2082_v9, %s2038_s25  ;;  %876 = vrot.lane.b32.xlu1 %v2090_v11, %s2038_s25 }
  0x3d   :  { %878 = vrot.lane.b32.xlu0 %v2084_v10, %s2038_s25  ;;  %880 = vrot.lane.b32.xlu1 %v2094_v12, %s2038_s25 }
  0x41   :  { %882 = vrot.lane.b32.xlu0 %v2099_v13, %s2038_s25  ;;  %884 = vrot.lane.b32.xlu1 %v2105_v14, %s2038_s25 }
  0x45   :  { %1044 = vrot.lane.b32.xlu0 %v2082_v9, %s2039_s26  ;;  %1046 = vrot.lane.b32.xlu1 %v2090_v11, %s2039_s26 }
  0x49   :  { %1048 = vrot.lane.b32.xlu0 %v2084_v10, %s2039_s26  ;;  %1050 = vrot.lane.b32.xlu1 %v2094_v12, %s2039_s26 }
  0x4d   :  { %1052 = vrot.lane.b32.xlu0 %v2099_v13, %s2039_s26  ;;  %1054 = vrot.lane.b32.xlu1 %v2105_v14, %s2039_s26 }
  0x51   :  { %1214 = vrot.lane.b32.xlu0 %v2082_v9, %s2040_s27  ;;  %1216 = vrot.lane.b32.xlu1 %v2090_v11, %s2040_s27 }
  0x55   :  { %1218 = vrot.lane.b32.xlu0 %v2084_v10, %s2040_s27  ;;  %1220 = vrot.lane.b32.xlu1 %v2094_v12, %s2040_s27 }
  0x59   :  { %1222 = vrot.lane.b32.xlu0 %v2099_v13, %s2040_s27  ;;  %1224 = vrot.lane.b32.xlu1 %v2105_v14, %s2040_s27 }
  0x5d   :  { %1384 = vrot.lane.b32.xlu0 %v2082_v9, %s2041_s28  ;;  %1386 = vrot.lane.b32.xlu1 %v2090_v11, %s2041_s28 }
  0x61   :  { %1388 = vrot.lane.b32.xlu0 %v2084_v10, %s2041_s28  ;;  %1390 = vrot.lane.b32.xlu1 %v2094_v12, %s2041_s28 }
  0x65   :  { %1392 = vrot.lane.b32.xlu0 %v2099_v13, %s2041_s28  ;;  %1394 = vrot.lane.b32.xlu1 %v2105_v14, %s2041_s28 }
  0x69   :  { %1555 = vperm.xlu0 %2005, %v1552_v15  }
  0x7b   :  { %v55_v16 = vpop.permute.xlu0 %54  ;;  %v59_v17 = vpop.permute.xlu1 %58 }
  0x7f   :  { %v57_v18 = vpop.permute.xlu0 %56  ;;  %v61_v19 = vpop.permute.xlu1 %60 }
  0x80   :  { %v68_v20 = vsel %vm66_vm0, %v57_v18, %v59_v17  ;;  %v67_v21 = vsel %vm66_vm0, %v55_v16, %v57_v18  ;;  %v69_v24 = vsel %vm66_vm0, %v59_v17, %v61_v19 }
  0x81   :  { %1890 = vmatprep.subr.msk.bf16.mxu0 %vm76_vm1, %v68_v20  ;;  %v78_v22 = vsel %vm76_vm1, %v67_v21, 0  ;;  %v84_v30 = vsel %vm76_vm1, %v69_v24, 0  ;;  %v1916_v21 = vld [vmem:[%s2634_s1 + $0x10] sm:$0xf] }
  0x82   :  { %110 = vmatpush1.bf16.msra.mxu0 %v78_v22 }
  0x83   :  { %v63_v25 = vpop.permute.xlu0 %62  ;;  %v65_v26 = vpop.permute.xlu1 %64 }
  0x84   :  { %v71_v27 = vsel %vm66_vm0, %v63_v25, %v65_v26  ;;  %1894 = vmatprep.subr.msk.bf16.mxu0 %vm76_vm1, %v65_v26  ;;  %v70_v28 = vsel %vm66_vm0, %v61_v19, %v63_v25 }
  0x85   :  { %v90_v29 = vsel %vm76_vm1, %v71_v27, 0  ;;  %1891 = vmatmul.mubr.msk.bf16.vlgmr.msra.gmra.mxu0 %vm72_vm2, %v1888_v23  ;;  %1892 = vmatprep.subr.msk.bf16.mxu1 %vm76_vm1, %v70_v28 }
  0x86   :  { %151 = vmatpush1.bf16.msra.mxu1 %v84_v30  ;;  %192 = vmatpush1.bf16.msra.mxu0 %v90_v29 }
  0x87   :  { %1896 = vmatprep.subr.msk.bf16.mxu1 %vm76_vm1, %v2090_v11  ;;  %209 = vmatprep.mubr.bf16.mxu0 %v2033_v7  ;;  %v365_v32 = vpop.permute.xlu0 %364  ;;  %v367_v33 = vpop.permute.xlu1 %366 }
  0x88   :  { %1898 = vmatprep.subr.msk.bf16.mxu0 %vm76_vm1, %v2094_v12  ;;  %v377_v42 = vsel %vm376_vm3, %v365_v32, %v367_v33 }
  0x89   :  { %1893 = vmatmul.mubr.msk.bf16.vlgmr.msra.gmra.mxu1 %vm72_vm2, %v1888_v23  ;;  %v386_v44 = vsel %vm76_vm1, %v377_v42, 0 }
  0x8a   :  { %254 = vmatpush1.bf16.msra.mxu1 %v222_v31  ;;  %271 = vmatprep.mubr.bf16.mxu1 %v2033_v7 }
  0x8b   :  { %v369_v35 = vpop.permute.xlu0 %368  ;;  %1900 = vmatprep.subr.msk.bf16.mxu1 %vm76_vm1, %v2105_v14  ;;  %v371_v36 = vpop.permute.xlu1 %370 }
  0x8c   :  { %v378_v37 = vsel %vm376_vm3, %v367_v33, %v369_v35  ;;  %v379_v47 = vsel %vm376_vm3, %v369_v35, %v371_v36 }
  0x8d   :  { %1895 = vmatmul.mubr.msk.bf16.vlgmr.msra.gmra.mxu0 %vm72_vm2, %v1888_v23  ;;  %v392_v48 = vsel %vm76_vm1, %v379_v47, 0 }
  0x8e   :  { %295 = vmatpush1.bf16.msra.mxu0 %v228_v34  ;;  %312 = vmatprep.mubr.bf16.mxu0 %v2033_v7 }
  0x8f   :  { %1903 = vmatprep.subr.msk.bf16.mxu0 %vm76_vm1, %v378_v37  ;;  %v373_v40 = vpop.permute.xlu0 %372  ;;  %v375_v41 = vpop.permute.xlu1 %374 }
  0x90   :  { %v380_v43 = vsel %vm376_vm3, %v371_v36, %v373_v40  ;;  %v381_v51 = vsel %vm376_vm3, %v373_v40, %v375_v41  ;;  %v1923_v36 = vld [vmem:[%s2634_s1 + $0x14] sm:$0xf] }
  0x91   :  { %1897 = vmatmul.mubr.msk.bf16.vlgmr.msra.gmra.mxu1 %vm72_vm2, %v24_v38  ;;  %v398_v54 = vsel %vm76_vm1, %v381_v51, 0  ;;  %v1930_v51 = vld [vmem:[%s2634_s1 + $0x18] sm:$0xf] }
  0x92   :  { %336 = vmatpush1.bf16.msra.mxu1 %v234_v39  ;;  %353 = vmatprep.mubr.bf16.mxu1 %v2033_v7 }
  0x93   :  { %1905 = vmatprep.subr.msk.bf16.mxu1 %vm76_vm1, %v380_v43  ;;  %v535_v45 = vpop.permute.xlu0 %534  ;;  %v537_v46 = vpop.permute.xlu1 %536 }
  0x94   :  { %v547_v57 = vsel %vm546_vm4, %v535_v45, %v537_v46 }
  0x95   :  { %1899 = vmatmul.mubr.msk.bf16.vlgmr.msra.gmra.mxu0 %vm72_vm2, %v24_v38  ;;  %v556_v59 = vsel %vm76_vm1, %v547_v57, 0 }
  0x96   :  { %418 = vmatpush1.bf16.msra.mxu0 %v386_v44  ;;  %435 = vmatprep.mubr.bf16.mxu0 %v2033_v7 }
  0x97   :  { %1907 = vmatprep.subr.msk.bf16.mxu0 %vm76_vm1, %v375_v41  ;;  %v539_v49 = vpop.permute.xlu0 %538  ;;  %v541_v50 = vpop.permute.xlu1 %540 }
  0x98   :  { %v548_v52 = vsel %vm546_vm4, %v537_v46, %v539_v49  ;;  %v549_v62 = vsel %vm546_vm4, %v539_v49, %v541_v50 }
  0x99   :  { %1901 = vmatmul.mubr.msk.bf16.vlgmr.msra.gmra.mxu1 %vm72_vm2, %v24_v38  ;;  %v562_v63 = vsel %vm76_vm1, %v549_v62, 0 }
  0x9a   :  { %459 = vmatpush1.bf16.msra.mxu1 %v392_v48  ;;  %476 = vmatprep.mubr.bf16.mxu1 %v2033_v7 }
  0x9b   :  { %1910 = vmatprep.subr.msk.bf16.mxu1 %vm76_vm1, %v548_v52  ;;  %v543_v55 = vpop.permute.xlu0 %542  ;;  %v545_v56 = vpop.permute.xlu1 %544 }
  0x9c   :  { %v550_v58 = vsel %vm546_vm4, %v541_v50, %v543_v55  ;;  %v551_v3 = vsel %vm546_vm4, %v543_v55, %v545_v56 }
  0x9d   :  { %1904 = vmatmul.mubr.msk.bf16.vlgmr.msra.gmra.mxu0 %vm72_vm2, %v1902_v53  ;;  %v568_v6 = vsel %vm76_vm1, %v551_v3, 0  ;;  %v1937_v3 = vld [vmem:[%s2634_s1 + $0x1c] sm:$0xf] }
  0x9e   :  { %500 = vmatpush1.bf16.msra.mxu0 %v398_v54  ;;  %517 = vmatprep.mubr.bf16.mxu0 %v2033_v7 }
  0x9f   :  { %1912 = vmatprep.subr.msk.bf16.mxu0 %vm76_vm1, %v550_v58  ;;  %v705_v60 = vpop.permute.xlu0 %704  ;;  %v707_v61 = vpop.permute.xlu1 %706 }
  0xa0   :  { %v717_v10 = vsel %vm716_vm5, %v705_v60, %v707_v61 }
  0xa1   :  { %1906 = vmatmul.mubr.msk.bf16.vlgmr.msra.gmra.mxu1 %vm72_vm2, %v1902_v53  ;;  %v726_v12 = vsel %vm76_vm1, %v717_v10, 0 }
  0xa2   :  { %588 = vmatpush1.bf16.msra.mxu1 %v556_v59  ;;  %605 = vmatprep.mubr.bf16.mxu1 %v2033_v7 }
  0xa3   :  { %1914 = vmatprep.subr.msk.bf16.mxu1 %vm76_vm1, %v545_v56  ;;  %v709_v0 = vpop.permute.xlu0 %708  ;;  %v711_v2 = vpop.permute.xlu1 %710 }
  0xa4   :  { %v718_v4 = vsel %vm716_vm5, %v707_v61, %v709_v0  ;;  %v719_v15 = vsel %vm716_vm5, %v709_v0, %v711_v2 }
  0xa5   :  { %1908 = vmatmul.mubr.msk.bf16.vlgmr.msra.gmra.mxu0 %vm72_vm2, %v1902_v53  ;;  %v732_v16 = vsel %vm76_vm1, %v719_v15, 0 }
  0xa6   :  { %629 = vmatpush1.bf16.msra.mxu0 %v562_v63  ;;  %646 = vmatprep.mubr.bf16.mxu0 %v2033_v7 }
  0xa7   :  { %1917 = vmatprep.subr.msk.bf16.mxu0 %vm76_vm1, %v718_v4  ;;  %v713_v8 = vpop.permute.xlu0 %712  ;;  %v715_v9 = vpop.permute.xlu1 %714 }
  0xa8   :  { %v720_v11 = vsel %vm716_vm5, %v711_v2, %v713_v8  ;;  %v721_v19 = vsel %vm716_vm5, %v713_v8, %v715_v9 }
  0xa9   :  { %1911 = vmatmul.mubr.msk.bf16.vlgmr.msra.gmra.mxu1 %vm72_vm2, %v1909_v5  ;;  %v738_v22 = vsel %vm76_vm1, %v721_v19, 0 }
  0xaa   :  { %670 = vmatpush1.bf16.msra.mxu1 %v568_v6  ;;  %687 = vmatprep.mubr.bf16.mxu1 %v2033_v7 }
  0xab   :  { %1919 = vmatprep.subr.msk.bf16.mxu1 %vm76_vm1, %v720_v11  ;;  %v875_v13 = vpop.permute.xlu0 %874  ;;  %v877_v14 = vpop.permute.xlu1 %876 }
  0xac   :  { %v887_v25 = vsel %vm886_vm6, %v875_v13, %v877_v14 }
  0xad   :  { %1913 = vmatmul.mubr.msk.bf16.vlgmr.msra.gmra.mxu0 %vm72_vm2, %v1909_v5  ;;  %v896_v27 = vsel %vm76_vm1, %v887_v25, 0 }
  0xae   :  { %758 = vmatpush1.bf16.msra.mxu0 %v726_v12  ;;  %775 = vmatprep.mubr.bf16.mxu0 %v2033_v7 }
  0xaf   :  { %1921 = vmatprep.subr.msk.bf16.mxu0 %vm76_vm1, %v715_v9  ;;  %v879_v17 = vpop.permute.xlu0 %878  ;;  %v881_v18 = vpop.permute.xlu1 %880 }
  0xb0   :  { %v888_v20 = vsel %vm886_vm6, %v877_v14, %v879_v17  ;;  %v889_v30 = vsel %vm886_vm6, %v879_v17, %v881_v18  ;;  %v1944_v14 = vld [vmem:[%s2634_s1 + $0x20] sm:$0xf] }
  0xb1   :  { %1915 = vmatmul.mubr.msk.bf16.vlgmr.msra.gmra.mxu1 %vm72_vm2, %v1909_v5  ;;  %v902_v31 = vsel %vm76_vm1, %v889_v30, 0 }
  0xb2   :  { %799 = vmatpush1.bf16.msra.mxu1 %v732_v16  ;;  %816 = vmatprep.mubr.bf16.mxu1 %v2033_v7 }
  0xb3   :  { %1924 = vmatprep.subr.msk.bf16.mxu1 %vm76_vm1, %v888_v20  ;;  %v883_v23 = vpop.permute.xlu0 %882  ;;  %v885_v24 = vpop.permute.xlu1 %884 }
  0xb4   :  { %v890_v26 = vsel %vm886_vm6, %v881_v18, %v883_v23  ;;  %v891_v34 = vsel %vm886_vm6, %v883_v23, %v885_v24 }
  0xb5   :  { %1918 = vmatmul.mubr.msk.bf16.vlgmr.msra.gmra.mxu0 %vm72_vm2, %v1916_v21  ;;  %v908_v37 = vsel %vm76_vm1, %v891_v34, 0 }
  0xb6   :  { %840 = vmatpush1.bf16.msra.mxu0 %v738_v22  ;;  %857 = vmatprep.mubr.bf16.mxu0 %v2033_v7 }
  0xb7   :  { %1926 = vmatprep.subr.msk.bf16.mxu0 %vm76_vm1, %v890_v26  ;;  %v1045_v28 = vpop.permute.xlu0 %1044  ;;  %v1047_v29 = vpop.permute.xlu1 %1046 }
  0xb8   :  { %v1057_v40 = vsel %vm1056_vm7, %v1045_v28, %v1047_v29 }
  0xb9   :  { %1920 = vmatmul.mubr.msk.bf16.vlgmr.msra.gmra.mxu1 %vm72_vm2, %v1916_v21  ;;  %v1066_v42 = vsel %vm76_vm1, %v1057_v40, 0 }
  0xba   :  { %928 = vmatpush1.bf16.msra.mxu1 %v896_v27  ;;  %945 = vmatprep.mubr.bf16.mxu1 %v2033_v7 }
  0xbb   :  { %1928 = vmatprep.subr.msk.bf16.mxu1 %vm76_vm1, %v885_v24  ;;  %v1049_v32 = vpop.permute.xlu0 %1048  ;;  %v1051_v33 = vpop.permute.xlu1 %1050 }
  0xbc   :  { %v1058_v35 = vsel %vm1056_vm7, %v1047_v29, %v1049_v32  ;;  %v1059_v45 = vsel %vm1056_vm7, %v1049_v32, %v1051_v33 }
  0xbd   :  { %1922 = vmatmul.mubr.msk.bf16.vlgmr.msra.gmra.mxu0 %vm72_vm2, %v1916_v21  ;;  %v1072_v46 = vsel %vm76_vm1, %v1059_v45, 0 }
  0xbe   :  { %969 = vmatpush1.bf16.msra.mxu0 %v902_v31  ;;  %986 = vmatprep.mubr.bf16.mxu0 %v2033_v7 }
  0xbf   :  { %1931 = vmatprep.subr.msk.bf16.mxu0 %vm76_vm1, %v1058_v35  ;;  %v1053_v38 = vpop.permute.xlu0 %1052  ;;  %v1055_v39 = vpop.permute.xlu1 %1054 }
  0xc0   :  { %v1060_v41 = vsel %vm1056_vm7, %v1051_v33, %v1053_v38  ;;  %v1061_v49 = vsel %vm1056_vm7, %v1053_v38, %v1055_v39 }
  0xc1   :  { %1925 = vmatmul.mubr.msk.bf16.vlgmr.msra.gmra.mxu1 %vm72_vm2, %v1923_v36  ;;  %v1078_v52 = vsel %vm76_vm1, %v1061_v49, 0 }
  0xc2   :  { %1010 = vmatpush1.bf16.msra.mxu1 %v908_v37  ;;  %1027 = vmatprep.mubr.bf16.mxu1 %v2033_v7  ;;  %v1571_v37 = vand.u32 127, %v33_v1 }
  0xc3   :  { %1933 = vmatprep.subr.msk.bf16.mxu1 %vm76_vm1, %v1060_v41  ;;  %v1215_v43 = vpop.permute.xlu0 %1214  ;;  %v1217_v44 = vpop.permute.xlu1 %1216 }
  0xc4   :  { %v1227_v55 = vsel %vm1226_vm8, %v1215_v43, %v1217_v44 }
  0xc5   :  { %1927 = vmatmul.mubr.msk.bf16.vlgmr.msra.gmra.mxu0 %vm72_vm2, %v1923_v36  ;;  %v1236_v57 = vsel %vm76_vm1, %v1227_v55, 0 }
  0xc6   :  { %1098 = vmatpush1.bf16.msra.mxu0 %v1066_v42  ;;  %1115 = vmatprep.mubr.bf16.mxu0 %v2033_v7 }
  0xc7   :  { %1935 = vmatprep.subr.msk.bf16.mxu0 %vm76_vm1, %v1055_v39  ;;  %v1219_v47 = vpop.permute.xlu0 %1218  ;;  %v1221_v48 = vpop.permute.xlu1 %1220 }
  0xc8   :  { %v1228_v50 = vsel %vm1226_vm8, %v1217_v44, %v1219_v47  ;;  %v1229_v60 = vsel %vm1226_vm8, %v1219_v47, %v1221_v48  ;;  %v1572_v44 = vadd.s32 128, %v1571_v37 }
  0xc9   :  { %1929 = vmatmul.mubr.msk.bf16.vlgmr.msra.gmra.mxu1 %vm72_vm2, %v1923_v36  ;;  %v1242_v61 = vsel %vm76_vm1, %v1229_v60, 0 }
  0xca   :  { %1139 = vmatpush1.bf16.msra.mxu1 %v1072_v46  ;;  %1156 = vmatprep.mubr.bf16.mxu1 %v2033_v7 }
  0xcb   :  { %1938 = vmatprep.subr.msk.bf16.mxu1 %vm76_vm1, %v1228_v50  ;;  %v1223_v53 = vpop.permute.xlu0 %1222  ;;  %v1225_v54 = vpop.permute.xlu1 %1224 }
  0xcc   :  { %v1230_v56 = vsel %vm1226_vm8, %v1221_v48, %v1223_v53  ;;  %v1231_v63 = vsel %vm1226_vm8, %v1223_v53, %v1225_v54 }
  0xcd   :  { %1932 = vmatmul.mubr.msk.bf16.vlgmr.msra.gmra.mxu0 %vm72_vm2, %v1930_v51  ;;  %v1248_v4 = vsel %vm76_vm1, %v1231_v63, 0 }
  0xce   :  { %1180 = vmatpush1.bf16.msra.mxu0 %v1078_v52  ;;  %1197 = vmatprep.mubr.bf16.mxu0 %v2033_v7  ;;  %v2351_v1 = vmul.u32.u64.low 3393554407, %v1572_v44  ;;  %v2352_v52 = vmul.u32.u64.high 3393554407, %v1572_v44, %v2351_v1 }
  0xcf   :  { %1940 = vmatprep.subr.msk.bf16.mxu0 %vm76_vm1, %v1230_v56  ;;  %v1385_v58 = vpop.permute.xlu0 %1384  ;;  %v1387_v59 = vpop.permute.xlu1 %1386 }
  0xd0   :  { %v1397_v6 = vsel %vm1396_vm9, %v1385_v58, %v1387_v59  ;;  %v1594_v63 = vshrl.u32 %v2352_v52, 8 }
  0xd1   :  { %1934 = vmatmul.mubr.msk.bf16.vlgmr.msra.gmra.mxu1 %vm72_vm2, %v1930_v51  ;;  %v1406_v9 = vsel %vm76_vm1, %v1397_v6, 0 }
  0xd2   :  { %1268 = vmatpush1.bf16.msra.mxu1 %v1236_v57  ;;  %1285 = vmatprep.mubr.bf16.mxu1 %v2033_v7 }
  0xd3   :  { %1942 = vmatprep.subr.msk.bf16.mxu1 %vm76_vm1, %v1225_v54  ;;  %v1389_v62 = vpop.permute.xlu0 %1388  ;;  %v1391_v2 = vpop.permute.xlu1 %1390 }
  0xd4   :  { %v1398_v0 = vsel %vm1396_vm9, %v1387_v59, %v1389_v62  ;;  %v1399_v10 = vsel %vm1396_vm9, %v1389_v62, %v1391_v2  ;;  %v1573_v59 = vadd.s32 256, %v1571_v37 }
  0xd5   :  { %1936 = vmatmul.mubr.msk.bf16.vlgmr.msra.gmra.mxu0 %vm72_vm2, %v1930_v51  ;;  %v1412_v12 = vsel %vm76_vm1, %v1399_v10, 0  ;;  %v2348_v50 = vmul.u32.u64.low 3393554407, %v1571_v37  ;;  %v2349_v51 = vmul.u32.u64.high 3393554407, %v1571_v37, %v2348_v50  ;;  %v1595_v10 = vmul.u32 324, %v1594_v63 }
  0xd6   :  { %1309 = vmatpush1.bf16.msra.mxu0 %v1242_v61  ;;  %1326 = vmatprep.mubr.bf16.mxu0 %v2033_v7 }
  0xd7   :  { %1945 = vmatprep.subr.msk.bf16.mxu0 %vm76_vm1, %v1398_v0  ;;  %v1393_v5 = vpop.permute.xlu0 %1392  ;;  %v1395_v11 = vpop.permute.xlu1 %1394  ;;  %v1583_v62 = vshrl.u32 %v2349_v51, 8 }
  0xd8   :  { %v1400_v8 = vsel %vm1396_vm9, %v1391_v2, %v1393_v5  ;;  %v1401_v13 = vsel %vm1396_vm9, %v1393_v5, %v1395_v11  ;;  %v1574_v5 = vadd.s32 384, %v1571_v37 }
  0xd9   :  { %1939 = vmatmul.mubr.msk.bf16.vlgmr.msra.gmra.mxu1 %vm72_vm2, %v1937_v3  ;;  %v1418_v15 = vsel %vm76_vm1, %v1401_v13, 0 }
  0xda   :  { %1350 = vmatpush1.bf16.msra.mxu1 %v1248_v4  ;;  %1367 = vmatprep.mubr.bf16.mxu1 %v2033_v7 }
  0xdb   :  { %1947 = vmatprep.subr.msk.bf16.mxu1 %vm76_vm1, %v1400_v8 }
  0xdd   :  { %1941 = vmatmul.mubr.msk.bf16.vlgmr.msra.gmra.mxu0 %vm72_vm2, %v1937_v3 }
  0xde   :  { %1438 = vmatpush1.bf16.msra.mxu0 %v1406_v9  ;;  %1455 = vmatprep.mubr.bf16.mxu0 %v2033_v7  ;;  %v1584_v9 = vmul.u32 324, %v1583_v62 }
  0xdf   :  { %1949 = vmatprep.subr.msk.bf16.mxu0 %vm76_vm1, %v1395_v11 }
  0xe1   :  { %1943 = vmatmul.mubr.msk.bf16.vlgmr.msra.gmra.mxu1 %vm72_vm2, %v1937_v3  ;;  %v2366_v3 = vmul.u32.u64.low 3393554407, %v1573_v59  ;;  %v2367_v4 = vmul.u32.u64.high 3393554407, %v1573_v59, %v2366_v3 }
  0xe2   :  { %1479 = vmatpush1.bf16.msra.mxu1 %v1412_v12  ;;  %1496 = vmatprep.mubr.bf16.mxu1 %v2033_v7 }
  0xe5   :  { %1946 = vmatmul.mubr.msk.bf16.vlgmr.msra.gmra.mxu0 %vm72_vm2, %v1944_v14 }
  0xe6   :  { %1520 = vmatpush1.bf16.msra.mxu0 %v1418_v15  ;;  %1537 = vmatprep.mubr.bf16.mxu0 %v2033_v7  ;;  %v1575_v15 = vadd.s32 512, %v1571_v37 }
  0xe9   :  { %1948 = vmatmul.mubr.msk.bf16.vlgmr.msra.gmra.mxu1 %vm72_vm2, %v1944_v14 }
  0xed   :  { %1950 = vmatmul.mubr.msk.bf16.vlgmr.msra.gmra.mxu0 %vm72_vm2, %v1944_v14  ;;  %v2373_v13 = vmul.u32.u64.low 3393554407, %v1574_v5  ;;  %v2374_v14 = vmul.u32.u64.high 3393554407, %v1574_v5, %v2373_v13 }
 0x145   :  { %v129_v16 = vpop.f32.mrf.mxu0 }
 0x147   :  { %v131_v17 = vpop.f32.mrf.mxu0 }
 0x149   :  { %v133_v18 = vpop.f32.mrf.mxu0  ;;  %v170_v19 = vpop.f32.mrf.mxu1 }
 0x14a   :  { %v2378_v18 = vsub.s32 %v1571_v37, %v1584_v9 }
 0x14b   :  { %v134_v20 = vpop.f32.mrf.mxu0  ;;  %v172_v21 = vpop.f32.mrf.mxu1 }
 0x14c   :  { %vm1643_vm10 = vcmp.lt.s32.totalorder %v2378_v18, 0 }
 0x14d   :  { %v174_v22 = vpop.f32.mrf.mxu1  ;;  %v211_v23 = vpop.f32.mrf.mxu0 }
 0x14e   :  { %v1605_v22 = vshrl.u32 %v2367_v4, 8 }
 0x14f   :  { %v175_v24 = vpop.f32.mrf.mxu1  ;;  %v213_v25 = vpop.f32.mrf.mxu0 }
 0x151   :  { %v215_v26 = vpop.f32.mrf.mxu0  ;;  %v273_v27 = vpop.f32.mrf.mxu1 }
 0x152   :  { %v274_v28 = vadd.f32 %v273_v27, %v129_v16  ;;  %v1644_v27 = vsub.s32 0, %v2378_v18 }
 0x153   :  { %v216_v29 = vpop.f32.mrf.mxu0  ;;  %v275_v30 = vpop.f32.mrf.mxu1 }
 0x154   :  { %v2333_v7 = vadd.f32 %v275_v30, %v131_v17 }
 0x155   :  { %v277_v31 = vpop.f32.mrf.mxu1  ;;  %v314_v32 = vpop.f32.mrf.mxu0 }
 0x156   :  { %v2335_v33 = vadd.f32 %v314_v32, %v170_v19  ;;  %v2380_v19 = vsub.s32 %v1572_v44, %v1595_v10  ;;  %v1606_v32 = vmul.u32 324, %v1605_v22 }
 0x157   :  { %v278_v34 = vpop.f32.mrf.mxu1  ;;  %v316_v35 = vpop.f32.mrf.mxu0 }
 0x158   :  { %v2337_v36 = vadd.f32 %v316_v35, %v172_v21  ;;  %v1655_v29 = vsub.s32 0, %v2380_v19  ;;  %v1616_v34 = vshrl.u32 %v2374_v14, 8  ;;  %vm1654_vm11 = vcmp.lt.s32.totalorder %v2380_v19, 0 }
 0x159   :  { %v318_v38 = vpop.f32.mrf.mxu0  ;;  %v355_v39 = vpop.f32.mrf.mxu1 }
 0x15a   :  { %v2340_v40 = vadd.f32 %v355_v39, %v211_v23  ;;  %v2385_v23 = vmul.u32.u64.low 3393554407, %v1575_v15  ;;  %v2386_v24 = vmul.u32.u64.high 3393554407, %v1575_v15, %v2385_v23  ;;  %v1951_v39 = vmin.u32 %v1644_v27, %v2378_v18 }
 0x15b   :  { %v319_v41 = vpop.f32.mrf.mxu0  ;;  %v357_v42 = vpop.f32.mrf.mxu1  ;;  %v1952_v44 = vmin.u32 %v1655_v29, %v2380_v19 }
 0x15c   :  { %v2342_v43 = vadd.f32 %v357_v42, %v213_v25  ;;  %v1627_v50 = vshrl.u32 %v2386_v24, 8 }
 0x15d   :  { %v359_v45 = vpop.f32.mrf.mxu1  ;;  %v437_v46 = vpop.f32.mrf.mxu0 }
 0x15e   :  { %v2344_v47 = vadd.f32 %v437_v46, %v274_v28  ;;  %v1576_v28 = vadd.s32 640, %v1571_v37  ;;  %v2404_v46 = vsub.s32 %v1573_v59, %v1606_v32  ;;  %v1628_v59 = vmul.u32 324, %v1627_v50 }
 0x15f   :  { %v360_v48 = vpop.f32.mrf.mxu1  ;;  %v2346_v49 = vpop.f32.mrf.mxu0 }
 0x160   :  { %v2398_v41 = vmul.u32.u64.low 3393554407, %v1576_v28  ;;  %v2399_v42 = vmul.u32.u64.high 3393554407, %v1576_v28, %v2398_v41  ;;  %v1617_v48 = vmul.u32 324, %v1616_v34  ;;  %v1666_v63 = vsub.s32 0, %v2404_v46 }
 0x161   :  { %v441_v53 = vpop.f32.mrf.mxu0  ;;  %v2354_v54 = vpop.f32.mrf.mxu1  ;;  %v2427_v14 = vsub.s32 %v1575_v15, %v1628_v59  ;;  %vm1665_vm1 = vcmp.lt.s32.totalorder %v2404_v46, 0 }
 0x162   :  { %v2409_v52 = vmul.u32.u64.low 3817748708, %v1951_v39  ;;  %v2410_v53 = vmul.u32.u64.high 3817748708, %v1951_v39, %v2409_v52 }
 0x163   :  { %v442_v55 = vpop.f32.mrf.mxu0  ;;  %v2356_v56 = vpop.f32.mrf.mxu1  ;;  %v1688_v15 = vsub.s32 0, %v2427_v14  ;;  %vm1687_vm4 = vcmp.lt.s32.totalorder %v2427_v14, 0 }
 0x165   :  { %v482_v57 = vpop.f32.mrf.mxu1  ;;  %v2358_v58 = vpop.f32.mrf.mxu0  ;;  %v2453_v52 = vmin.u32 %v1688_v15, %v2427_v14 }
 0x166   :  { %v2412_v55 = vmul.u32.u64.low 3817748708, %v1952_v44  ;;  %v2413_v57 = vmul.u32.u64.high 3817748708, %v1952_v44, %v2412_v55 }
 0x167   :  { %v483_v60 = vpop.f32.mrf.mxu1  ;;  %v2360_v61 = vpop.f32.mrf.mxu0 }
 0x168   :  { %v1660_v23 = vshrl.u32 %v2413_v57, 4 }
 0x169   :  { %v523_v0 = vpop.f32.mrf.mxu0  ;;  %v2364_v2 = vpop.f32.mrf.mxu1 }
 0x16a   :  { %v2418_v0 = vsub.s32 %v1574_v5, %v1617_v48  ;;  %v1649_v5 = vshrl.u32 %v2410_v53, 4 }
 0x16b   :  { %v524_v6 = vpop.f32.mrf.mxu0  ;;  %v2369_v8 = vpop.f32.mrf.mxu1 }
 0x16c   :  { %v1638_v6 = vshrl.u32 %v2399_v42, 8  ;;  %v1677_v13 = vsub.s32 0, %v2418_v0  ;;  %v1727_v42 = vmul.u32 18, %v1660_v23  ;;  %vm1676_vm3 = vcmp.lt.s32.totalorder %v2418_v0, 0 }
 0x16d   :  { %v611_v11 = vpop.f32.mrf.mxu1  ;;  %v2371_v12 = vpop.f32.mrf.mxu0 }
 0x16e   :  { %v1953_v11 = vmin.u32 %v1666_v63, %v2404_v46  ;;  %v1639_v22 = vmul.u32 324, %v1638_v6  ;;  %v1728_v63 = vsub.s32 %v1952_v44, %v1727_v42 }
 0x16f   :  { %v612_v16 = vpop.f32.mrf.mxu1  ;;  %v2376_v17 = vpop.f32.mrf.mxu0 }
 0x170   :  { %v2435_v27 = vmul.u32.u64.low 3817748708, %v1953_v11  ;;  %v2436_v29 = vmul.u32.u64.high 3817748708, %v1953_v11, %v2435_v27  ;;  %v2444_v41 = vsub.s32 %v1576_v28, %v1639_v22  ;;  %v1652_v22 = vsub.s32 0, %v1649_v5 }
 0x171   :  { %v652_v20 = vpop.f32.mrf.mxu0  ;;  %v2382_v21 = vpop.f32.mrf.mxu1  ;;  %v1729_v44 = vsub.s32 0, %v1728_v63 }
 0x172   :  { %vm1698_vm9 = vcmp.lt.s32.totalorder %v2444_v41, 0 }
 0x173   :  { %v653_v25 = vpop.f32.mrf.mxu0  ;;  %v2388_v26 = vpop.f32.mrf.mxu1 }
 0x175   :  { %v693_v30 = vpop.f32.mrf.mxu1  ;;  %v2392_v31 = vpop.f32.mrf.mxu0 }
 0x176   :  { %v2439_v30 = vmin.u32 %v1677_v13, %v2418_v0 }
 0x177   :  { %v694_v35 = vpop.f32.mrf.mxu1  ;;  %v2395_v38 = vpop.f32.mrf.mxu0 }
 0x178   :  { %v1716_v35 = vmul.u32 18, %v1649_v5 }
 0x179   :  { %v781_v45 = vpop.f32.mrf.mxu0  ;;  %v2402_v37 = vpop.f32.mrf.mxu1 }
 0x17a   :  { %v1717_v57 = vsub.s32 %v1951_v39, %v1716_v35  ;;  %v1663_v39 = vsub.s32 0, %v1660_v23 }
 0x17b   :  { %v782_v51 = vpop.f32.mrf.mxu0  ;;  %v2407_v1 = vpop.f32.mrf.mxu1 }
 0x17c   :  { %v2449_v50 = vmul.u32.u64.low 3817748708, %v2439_v30  ;;  %v2450_v51 = vmul.u32.u64.high 3817748708, %v2439_v30, %v2449_v50  ;;  %v1664_v18 = vsel %vm1654_vm11, %v1663_v39, %v1660_v23 }
 0x17d   :  { %v822_v60 = vpop.f32.mrf.mxu1  ;;  %v2415_v62 = vpop.f32.mrf.mxu0  ;;  %v1653_v50 = vsel %vm1643_vm10, %v1652_v22, %v1649_v5  ;;  %vm1776_vm14 = vcmp.lt.s32.totalorder %v1664_v18, 16 }
 0x17e   :  { %v1699_v60 = vsub.s32 0, %v2444_v41  ;;  %v1682_v35 = vshrl.u32 %v2450_v51, 4  ;;  %vm1775_vm12 = vcmp.lt.s32.totalorder %v1653_v50, 16  ;;  %v696_v50 = vadd.f32 %v2364_v2, %v2344_v47 }
 0x17f   :  { %v823_v3 = vpop.f32.mrf.mxu1  ;;  %v2420_v4 = vpop.f32.mrf.mxu0 }
 0x180   :  { %v1671_v3 = vshrl.u32 %v2436_v29, 4  ;;  %v2468_v27 = vmin.u32 %v1699_v60, %v2444_v41  ;;  %v1749_v51 = vmul.u32 18, %v1682_v35 }
 0x181   :  { %v863_v9 = vpop.f32.mrf.mxu0  ;;  %v2423_v10 = vpop.f32.mrf.mxu1 }
 0x182   :  { %v2462_v6 = vmul.u32.u64.low 3817748708, %v2453_v52  ;;  %v2463_v9 = vmul.u32.u64.high 3817748708, %v2453_v52, %v2462_v6  ;;  %v1738_v29 = vmul.u32 18, %v1671_v3 }
 0x183   :  { %v864_v16 = vpop.f32.mrf.mxu0  ;;  %v2429_v20 = vpop.f32.mrf.mxu1  ;;  %v1730_v6 = vsel %vm1654_vm11, %v1729_v44, %v1728_v63  ;;  %v1685_v63 = vsub.s32 0, %v1682_v35  ;;  %v1750_v44 = vsub.s32 %v2439_v30, %v1749_v51 }
 0x184   :  { %vm1782_vm15 = vcmp.lt.s32.totalorder %v1730_v6, 16  ;;  %v1693_v5 = vshrl.u32 %v2463_v9, 4  ;;  %v527_v9 = vadd.f32 %v2346_v49, %v2333_v7  ;;  %v528_v49 = vadd.f32 %v2354_v54, %v2335_v33 }
 0x185   :  { %v951_v24 = vpop.f32.mrf.mxu1  ;;  %v2433_v25 = vpop.f32.mrf.mxu0  ;;  %vm1788_vm2 = vmand %vm1776_vm14, %vm1782_vm15  ;;  %v2512_v7 = vsel %vm1676_vm3, %v1685_v63, %v1682_v35  ;;  %v1751_v46 = vsub.s32 0, %v1750_v44 }
 0x186   :  { %v1718_v24 = vsub.s32 0, %v1717_v57  ;;  %v1696_v47 = vsub.s32 0, %v1693_v5  ;;  %v697_v2 = vadd.f32 %v2369_v8, %v527_v9  ;;  %v698_v33 = vadd.f32 %v2371_v12, %v528_v49 }
 0x187   :  { %v952_v32 = vpop.f32.mrf.mxu1  ;;  %v2442_v34 = vpop.f32.mrf.mxu0  ;;  %vm1778_vm7 = vcmp.lt.s32.totalorder %v2512_v7, 16 }
 0x188   :  { %v867_v54 = vadd.f32 %v2395_v38, %v697_v2 }
 0x189   :  { %v992_v45 = vpop.f32.mrf.mxu0  ;;  %v2446_v48 = vpop.f32.mrf.mxu1 }
 0x18a   :  { %2639 = vst [vmem:[#allocation5_spill] sm:$0xff] %v2446_v48  ;;  %v1037_v12 = vadd.f32 %v2429_v20, %v867_v54 }
 0x18b   :  { %v993_v53 = vpop.f32.mrf.mxu0  ;;  %v2455_v55 = vpop.f32.mrf.mxu1 }
 0x18c   :  { %2640 = vst [vmem:[#allocation6_spill] sm:$0xff] %v2455_v55  ;;  %v1719_v53 = vsel %vm1643_vm10, %v1718_v24, %v1717_v57  ;;  %v1739_v55 = vsub.s32 %v1953_v11, %v1738_v29  ;;  %v1674_v57 = vsub.s32 0, %v1671_v3  ;;  %v1760_v29 = vmul.u32 18, %v1693_v5 }
 0x18d   :  { %v1033_v28 = vpop.f32.mrf.mxu1  ;;  %v2458_v59 = vpop.f32.mrf.mxu0  ;;  %vm1781_vm13 = vcmp.lt.s32.totalorder %v1719_v53, 16  ;;  %v2042_v53 = vmov 0.0  }
 0x18e   :  { %v2478_v60 = vmul.u32.u64.low 3817748708, %v2468_v27  ;;  %v2479_v28 = vmul.u32.u64.high 3817748708, %v2468_v27, %v2478_v60  ;;  %vm1787_vm0 = vmand %vm1775_vm12, %vm1781_vm13  ;;  %v1740_v23 = vsub.s32 0, %v1739_v55  ;;  %v2501_v18 = vsel %vm1665_vm1, %v1674_v57, %v1671_v3 }
 0x18f   :  { %v1034_v13 = vpop.f32.mrf.mxu1  ;;  %v2465_v16 = vpop.f32.mrf.mxu0  ;;  %v2497_v60 = vsel %vm1787_vm0, 1.0, %v2042_v53  ;;  %v866_v3 = vadd.f32 %v2392_v31, %v696_v50  ;;  %vm1777_vm5 = vcmp.lt.s32.totalorder %v2501_v18, 16  ;;  %v529_v57 = vadd.f32 %v2356_v56, %v2337_v36 }
 0x190   :  { %v868_v56 = vadd.f32 %v2402_v37, %v698_v33  ;;  %v1207_v37 = vadd.f32 %v2465_v16, %v1037_v12 }
 0x191   :  { %v1121_v15 = vpop.f32.mrf.mxu0  ;;  %v2471_v32 = vpop.f32.mrf.mxu1  ;;  %v1036_v8 = vadd.f32 %v2423_v10, %v866_v3  ;;  %v699_v36 = vadd.f32 %v2376_v17, %v529_v57  ;;  %v530_v10 = vadd.f32 %v2358_v58, %v2340_v40  ;;  %v531_v40 = vadd.f32 %v2360_v61, %v2342_v43 }
 0x192   :  { %v1038_v17 = vadd.f32 %v2433_v25, %v868_v56 }
 0x193   :  { %v1122_v42 = vpop.f32.mrf.mxu0  ;;  %v2475_v45 = vpop.f32.mrf.mxu1  ;;  %v1206_v38 = vadd.f32 %v2458_v59, %v1036_v8  ;;  %v869_v50 = vadd.f32 %v2407_v1, %v699_v36  ;;  %v700_v58 = vadd.f32 %v2382_v21, %v530_v10 }
 0x194   :  { %v2490_v42 = vshrl.u32 %v2479_v28, 4  ;;  %v2508_v28 = vsel %vm1665_vm1, %v1740_v23, %v1739_v55  ;;  %v1761_v55 = vsub.s32 %v2453_v52, %v1760_v29  ;;  %v2533_v52 = vsel %vm1687_vm4, %v1696_v47, %v1693_v5 }
 0x195   :  { %v1162_v13 = vpop.f32.mrf.mxu1  ;;  %v2481_v15 = vpop.f32.mrf.mxu0  ;;  %vm1783_vm6 = vcmp.lt.s32.totalorder %v2508_v28, 16  ;;  %v1752_v29 = vsel %vm1676_vm3, %v1751_v46, %v1750_v44  ;;  %vm1779_vm8 = vcmp.lt.s32.totalorder %v2533_v52, 16  ;;  %v1039_v1 = vadd.f32 %v2442_v34, %v869_v50 }
 0x196   :  { %v2504_v13 = vsel %vm1788_vm2, 1.0, %v2042_v53  ;;  %v1771_v35 = vmul.u32 18, %v2490_v42  ;;  %v1707_v23 = vsub.s32 0, %v2490_v42  ;;  %v1762_v5 = vsub.s32 0, %v1761_v55  ;;  %vm1789_vm11 = vmand %vm1777_vm5, %vm1783_vm6 }
 0x197   :  { %v1163_v19 = vpop.f32.mrf.mxu1  ;;  %v2483_v48 = vpop.f32.mrf.mxu0  ;;  %v1208_v25 = vadd.f32 %v2471_v32, %v1038_v17  ;;  %v870_v44 = vadd.f32 %v2415_v62, %v700_v58  ;;  %v1209_v49 = vadd.f32 %v2475_v45, %v1039_v1  ;;  %vm1784_vm10 = vcmp.lt.s32.totalorder %v1752_v29, 16 }
 0x198   :  { %v1772_v9 = vsub.s32 %v2468_v27, %v1771_v35  ;;  %v1763_v61 = vsel %vm1687_vm4, %v1762_v5, %v1761_v55  ;;  %v1708_v62 = vsel %vm1698_vm9, %v1707_v23, %v2490_v42  ;;  %vm1790_vm13 = vmand %vm1778_vm7, %vm1784_vm10  ;;  %v1965_v41 = vsel %vm1789_vm11, 1.0, %v2042_v53 }
 0x199   :  { %v1203_v22 = vpop.f32.mrf.mxu0  ;;  %v1287_v24 = vpop.f32.mrf.mxu1  ;;  %vm1785_vm12 = vcmp.lt.s32.totalorder %v1763_v61, 16  ;;  %vm1780_vm14 = vcmp.lt.s32.totalorder %v1708_v62, 16  ;;  %vm1815_vm2 = vcmask 64512  }
 0x19a   :  { %v1376_v20 = vadd.f32 %v1287_v24, %v1206_v38  ;;  %v701_v24 = vadd.f32 %v2388_v26, %v531_v40  ;;  %v1773_v21 = vsub.s32 0, %v1772_v9  ;;  %vm1791_vm15 = vmand %vm1779_vm8, %vm1785_vm12 }
 0x19b   :  { %v1204_v11 = vpop.f32.mrf.mxu0  ;;  %v1289_v39 = vpop.f32.mrf.mxu1  ;;  %v1967_v52 = vsel %vm1791_vm15, 1.0, %v2042_v53 }
 0x19c   :  { %v1377_v27 = vadd.f32 %v1289_v39, %v1207_v37  ;;  %v871_v32 = vadd.f32 %v2420_v4, %v701_v24  ;;  %v2641_v39 = vld [vmem:[#allocation5_spill] sm:$0xff]  ;;  %v2642_v4 = vld [vmem:[#allocation6_spill] sm:$0xff]  ;;  %v1774_v42 = vsel %vm1698_vm9, %v1773_v21, %v1772_v9 }
 0x19d   :  { %v1291_v6 = vpop.f32.mrf.mxu1  ;;  %v1328_v30 = vpop.f32.mrf.mxu0  ;;  %vm1786_vm0 = vcmp.lt.s32.totalorder %v1774_v42, 16  ;;  %v1843_v42 = vld [vmem:[%s2637_s4] sm:$0xff] }
 0x19e   :  { %v2548_v6 = vpop.permute.xlu0 %1555  ;;  %v1378_v2 = vadd.f32 %v1328_v30, %v1208_v25  ;;  %v1041_v35 = vadd.f32 %v2642_v4, %v871_v32  ;;  %vm1792_vm1 = vmand %vm1780_vm14, %vm1786_vm0 }
 0x19f   :  { %v1292_v19 = vpop.f32.mrf.mxu1  ;;  %v1330_v51 = vpop.f32.mrf.mxu0 }
 0x1a0   :  { %v1040_v19 = vadd.f32 %v2641_v39, %v870_v44  ;;  %v1379_v14 = vadd.f32 %v1330_v51, %v1209_v49 }
 0x1a1   :  { %v1332_v31 = vpop.f32.mrf.mxu0  ;;  %v2527_v22 = vpop.f32.mrf.mxu1 }
 0x1a2   :  { %v1210_v57 = vadd.f32 %v2481_v15, %v1040_v19  ;;  %v1211_v15 = vadd.f32 %v2483_v48, %v1041_v35 }
 0x1a3   :  { %v1333_v63 = vpop.f32.mrf.mxu0  ;;  %v1371_v11 = vpop.f32.mrf.mxu1 }
 0x1a4   :  { %v1380_v31 = vadd.f32 %v2527_v22, %v1210_v57  ;;  %v1381_v48 = vadd.f32 %v1371_v11, %v1211_v15  ;;  %v1966_v22 = vsel %vm1790_vm13, 1.0, %v2042_v53  ;;  %v1839_v57 = vld [vmem:[%s2636_s3] sm:$0xff]  ;;  %s2043_s3 = smov [#allocation2]  }
 0x1a5   :  { %v1373_v59 = vpop.f32.mrf.mxu1  ;;  %v1457_v0 = vpop.f32.mrf.mxu0  ;;  %s1880_s25 = sshll.u32 %s2043_s3, 4  ;;  %s1881_s25 = int_to_ptr.vmem [resolvable:$true] %s1880_s25 }
 0x1a6   :  { %v1546_v16 = vadd.f32 %v1457_v0, %v1376_v20  ;;  %s2010_s4 = scalar_lea.vmem %s1881_s25, 768  ;;  %p2015_p1 = scmp.lt.s32.totalorder %s1881_s25, %s1881_s25 }
 0x1a7   :  { %v1374_v47 = vpop.f32.mrf.mxu1  ;;  %v1459_v43 = vpop.f32.mrf.mxu0  ;;  %p2011_p0 = scmp.ne.s32.totalorder %s1881_s25, %s2010_s4  ;;  %p2016_p2 = scmp.lt.s32.totalorder %s2010_s4, %s2010_s4 }
 0x1a8   :  { %v1547_v3 = vadd.f32 %v1459_v43, %v1377_v27  ;;  %v2563_v34 = vadd.f32 %v2548_v6, %v1546_v16  ;;  %v1968_v27 = vsel %vm1792_vm1, 1.0, %v2042_v53 }
 0x1a9   :  { %v1461_v26 = vpop.f32.mrf.mxu0  ;;  %v1498_v46 = vpop.f32.mrf.mxu1  ;;  %p2017_p3 = por %p2016_p2, %p2015_p1 }
 0x1aa   :  { %v2571_v55 = vadd.f32 %v2548_v6, %v1547_v3  ;;  %v1564_v45 = vmax.f32 %v2563_v34, 0.0  ;;  %v1548_v30 = vadd.f32 %v1498_v46, %v1378_v2 }
 0x1ab   :  { %v1462_v33 = vpop.f32.mrf.mxu0  ;;  %v1500_v54 = vpop.f32.mrf.mxu1  ;;  %p2018_p4 = pnand %p2017_p3, %p2011_p0 }
 0x1ac   :  { %v1565_v51 = vmax.f32 %v2571_v55, 0.0  ;;  %v1805_v8 = vmul.f32 %v2497_v60, %v1564_v45  ;;  %v2587_v28 = vadd.f32 %v2548_v6, %v1548_v30  ;;  %v1549_v18 = vadd.f32 %v1500_v54, %v1379_v14 }
 0x1ad   :  { %v1502_v23 = vpop.f32.mrf.mxu1  ;;  %v1539_v36 = vpop.f32.mrf.mxu0 }
 0x1ae   :  { %v1806_v60 = vmul.f32 %v2504_v13, %v1565_v51  ;;  %v1566_v56 = vmax.f32 %v2587_v28, 0.0  ;;  %v2600_v12 = vadd.f32 %v2548_v6, %v1549_v18  ;;  %v1820_v7 = vmul.f32 %v1805_v8, %v1805_v8 }
 0x1af   :  { %v1550_v38 = vadd.f32 %v1539_v36, %v1380_v31  ;;  %v1503_v10 = vpop.f32.mrf.mxu1  ;;  %v1541_v63 = vpop.f32.mrf.mxu0 }
 0x1b0   :  { %v1811_v29 = vadd.f32 %v1806_v60, %v1805_v8  ;;  %v1821_v5 = vmul.f32 %v1806_v60, %v1806_v60  ;;  %v1807_v13 = vmul.f32 %v1965_v41, %v1566_v56  ;;  %v1567_v9 = vmax.f32 %v2600_v12, 0.0 }
 0x1b1   :  { %v1562_v50 = vadd.f32 %v2548_v6, %v1550_v38  ;;  %v1551_v17 = vadd.f32 %v1541_v63, %v1381_v48  ;;  %v1543_v37 = vpop.f32.mrf.mxu0 }
 0x1b2   :  { %v1826_v11 = vadd.f32 %v1821_v5, %v1820_v7  ;;  %v1812_v20 = vadd.f32 %v1811_v29, %v1807_v13  ;;  %v1822_v40 = vmul.f32 %v1807_v13, %v1807_v13  ;;  %v1808_v58 = vmul.f32 %v1966_v22, %v1567_v9 }
 0x1b3   :  { %v1568_v59 = vmax.f32 %v1562_v50, 0.0  ;;  %v1563_v0 = vadd.f32 %v2548_v6, %v1551_v17  ;;  %v1544_v1 = vpop.f32.mrf.mxu0 }
 0x1b4   :  { %v1823_v25 = vmul.f32 %v1808_v58, %v1808_v58  ;;  %v1813_v16 = vadd.f32 %v1812_v20, %v1808_v58  ;;  %v1827_v24 = vadd.f32 %v1826_v11, %v1822_v40 }
 0x1b5   :  { %v1809_v44 = vmul.f32 %v1967_v52, %v1568_v59  ;;  %v1569_v47 = vmax.f32 %v1563_v0, 0.0 }
 0x1b6   :  { %v1828_v43 = vadd.f32 %v1827_v24, %v1823_v25 }
 0x1b7   :  { %v1810_v61 = vmul.f32 %v1968_v27, %v1569_v47  ;;  %v1814_v21 = vadd.f32 %v1813_v16, %v1809_v44  ;;  %v1824_v49 = vmul.f32 %v1809_v44, %v1809_v44 }
 0x1b9   :  { %v1816_v2 = vsel %vm1815_vm2, %v1810_v61, 0.0  ;;  %v1825_v3 = vmul.f32 %v1810_v61, %v1810_v61  ;;  %v1829_v32 = vadd.f32 %v1828_v43, %v1824_v49 }
 0x1ba   :  { %v1817_v39 = vadd.f32 %v1816_v2, %v1814_v21 }
 0x1bb   :  { %v1830_v6 = vsel %vm1815_vm2, %v1825_v3, 0.0 }
 0x1bc   :  { %1818 = vadd.xlane.f32.xlu1 %v1817_v39  ;;  %v1831_v19 = vadd.f32 %v1830_v6, %v1829_v32 }
 0x1be   :  { %1832 = vadd.xlane.f32.xlu0 %v1831_v19 }
 0x245   :  { %v1819_v53 = vpop.xlane.xlu1 %1818 }
 0x246   :  { %v1834_v26 = vmul.f32 0.001953125, %v1819_v53 }
 0x247   :  { %v1833_v46 = vpop.xlane.xlu0 %1832 }
 0x248   :  { %v1836_v62 = vmul.f32 %v1834_v26, %v1834_v26  ;;  %v1835_v14 = vmul.f32 0.001953125, %v1833_v46 }
 0x24a   :  { %v1837_v30 = vsub.f32 %v1835_v14, %v1836_v62 }
 0x24c   :  { %v1838_v4 = vmax.f32 %v1837_v30, 0.0 }
 0x24e   :  { %v1840_v35 = vadd.f32 1e-05, %v1838_v4 }
 0x250   :  { %2008 = vrsqrt.f32 %v1840_v35 }
 0x25d   :  { %v2009_v33 = vpop.eup %2008 }
 0x25e   :  { %v1842_v54 = vmul.f32 %v2009_v33, %v1839_v57 }
 0x260   :  { %1848 = vperm.xlu1 %2006, %v1842_v54   ;;  %v1844_v8 = vmul.f32 %v1842_v54, %v1834_v26 }
 0x262   :  { %v1845_v18 = vsub.f32 %v1843_v42, %v1844_v8 }
 0x264   :  { %1859 = vperm.xlu0 %2005, %v1845_v18  }
 0x2db   :  { %v1849_v15 = vpop.permute.xlu1 %1848 }
 0x2dc   :  { %v1851_v31 = vmul.f32 %v1849_v15, %v1564_v45  ;;  %v1852_v41 = vmul.f32 %v1849_v15, %v1565_v51  ;;  %v1853_v23 = vmul.f32 %v1849_v15, %v1566_v56  ;;  %v1854_v36 = vmul.f32 %v1849_v15, %v1567_v9 }
 0x2dd   :  { %v1855_v60 = vmul.f32 %v1849_v15, %v1568_v59  ;;  %v1856_v12 = vmul.f32 %v1849_v15, %v1569_v47 }
 0x2df   :  { %v1860_v48 = vpop.permute.xlu0 %1859 }
 0x2e0   :  { %v1862_v7 = vadd.f32 %v1860_v48, %v1851_v31  ;;  %v1863_v22 = vadd.f32 %v1860_v48, %v1852_v41  ;;  %v1864_v38 = vadd.f32 %v1860_v48, %v1853_v23  ;;  %v1865_v10 = vadd.f32 %v1860_v48, %v1854_v36 }
 0x2e1   :  { %v1866_v63 = vadd.f32 %v1860_v48, %v1855_v60  ;;  %v1867_v29 = vadd.f32 %v1860_v48, %v1856_v12 }
 0x2e2   :  { %1868 = vst [vmem:[#allocation2] sm:$0xff] %v1862_v7  ;;  %1869 = vst [vmem:[#allocation2 + $0x8] sm:$0xff] %v1863_v22 }
 0x2e3   :  { %1870 = vst [vmem:[#allocation2 + $0x10] sm:$0xff] %v1864_v38  ;;  %1871 = vst [vmem:[#allocation2 + $0x18] sm:$0xff] %v1865_v10 }
 0x2e4   :  { %1872 = vst [vmem:[#allocation2 + $0x20] sm:$0xff] %v1866_v63  ;;  %1873 = vst.msk [vmem:[#allocation2 + $0x28] sm:$0xff] %vm1815_vm2, %v1867_v29 }
 0x2e5   :  { %2021 = shalt.err (!%p2018_p4)
}
 0x2e6   :  { %1883 = dma.vmem_to_hbm [thread:$0]  %s1881_s25, 768, %s2638_s5, [#allocation3]  }
 0x2e7   :  { %2030 = dma.done.wait [#allocation3], 768  }
 0x2e8   :  { %2031 = vsyncadd [#allocation3], 4294966528 }
 0x2e9   :  { %1887 = vsyncpa [#allocation3], 1 }

</bundles_post_ra>
